<compile_context>
chip_gen: v5e
topology: v5e:2x2
jax: 0.10.0
libtpu: 0.0.40
codegen_flags: <defaults>
</compile_context>

<pallas_src>
import functools

import jax
import jax.numpy as jnp
from jax.experimental import pallas as pl
from jax.experimental.pallas import tpu as pltpu


def _l2norm_kernel(w_ref, x_ref, o_ref, *, eps, approx_reciprocal):
    # x_ref: (1, C, T) tile of one batch element; w_ref: (C, 1) f32 scale.
    x = x_ref[...].astype(jnp.float32)                    # (1, C, T)
    sq_sum = jnp.sum(x * x, axis=1, keepdims=True)        # (1, 1, T)
    # eps stays inside the reciprocal argument -> 1 / (sqrt(sum) + eps),
    # matching the PyTorch `sqrt(...) + eps` denominator placement.
    inv = pl.reciprocal(jnp.sqrt(sq_sum) + eps, approx=approx_reciprocal)
    w = w_ref[...][None, :, :]                            # (1, C, 1), already f32
    o_ref[...] = ((x * inv) * w).astype(o_ref.dtype)


def _vmem_capacity_bytes():
    """Physical VMEM per TensorCore; conservative fallback if the query fails."""
    try:
        cap = getattr(pltpu.get_tpu_info(), "vmem_capacity_bytes", None)
        if cap:
            return int(cap)
    except Exception:
        pass
    return 64 << 20  # v7x per-core VMEM — smallest of the supported chips.


def _sublane_tile(itemsize):
    # Sub-32-bit dtypes pack along sublanes: f32 -> 8, bf16 -> 16, int8 -> 32.
    return {4: 8, 2: 16, 1: 32}.get(itemsize, 8)


def _bytes_per_lane(C, itemsize):
    """VMEM bytes per lane column for one grid step, with honest padding:
    2 double-buffered input blocks + 2 output blocks (input dtype, channels
    padded to the sublane tile) + ~2 f32 block-sized in-kernel temporaries
    (the x.astype(f32) copy and x*x)."""
    st_in = _sublane_tile(itemsize)
    c_in = pl.cdiv(C, st_in) * st_in          # padded channel rows, input dtype
    c_f32 = pl.cdiv(C, 8) * 8                 # padded channel rows, f32 temps
    return 4 * c_in * itemsize + 2 * c_f32 * 4


def _pick_tile_hw(C, HW, itemsize, data_budget_bytes, lane_cap=1024):
    """Largest lane tile (multiple of 128), capped at `lane_cap` lanes, whose
    per-step footprint (with padding + f32 temps) fits the data budget."""
    per_lane = _bytes_per_lane(C, itemsize)
    max_tile = data_budget_bytes // per_lane
    max_tile = max(128, (max_tile // 128) * 128)
    max_tile = min(max_tile, lane_cap)
    if HW <= max_tile:
        return HW  # full-extent spatial block — always a legal block dim.
    return max_tile


def l2norm(x, weight, eps=1e-10, approx_reciprocal=False):
    """L2Norm forward. x: (N, C, H, W); weight: (C,). Returns x's shape/dtype.

    approx_reciprocal=True takes the EUP fast-reciprocal path (~1e-4 rel error
    in the denominator); False (default) matches the reference numerics.
    """
    N, C, H, W = x.shape
    HW = H * W
    itemsize = jnp.dtype(x.dtype).itemsize
    x2 = x.reshape(N, C, HW)
    w2 = weight.astype(jnp.float32).reshape(C, 1)  # pre-cast once, outside kernel

    vmem_cap = _vmem_capacity_bytes()
    # Budget ~ half of physical VMEM for the pipelined data blocks + temps;
    # the 1024-lane cap is what actually binds for realistic C.
    tile_hw = _pick_tile_hw(C, HW, itemsize,
                            data_budget_bytes=vmem_cap // 2,
                            lane_cap=1024)

    # v7x has 2 TensorCores sharded across the "parallel" grid axes: make sure
    # there are at least 2 grid steps. (Costs nothing on single-core v5e/v6e.)
    if N * pl.cdiv(HW, tile_hw) < 2 and HW > 128:
        half = pl.cdiv((HW + 1) // 2, 128) * 128   # round half up to 128-multiple
        half = min(half, tile_hw)
        if pl.cdiv(HW, half) >= 2:
            tile_hw = half

    grid = (N, pl.cdiv(HW, tile_hw))

    # VMEM limit: honest per-step footprint (blocks + f32 temps + resident
    # weight) with ~50% headroom for compiler scratch, clamped to physical.
    footprint = _bytes_per_lane(C, itemsize) * tile_hw + (pl.cdiv(C, 8) * 8) * 128 * 4
    vmem_limit = min(vmem_cap, max(int(footprint * 1.5) + (2 << 20), 8 << 20))

    kernel = functools.partial(_l2norm_kernel, eps=eps,
                               approx_reciprocal=approx_reciprocal)

    out = pl.pallas_call(
        kernel,
        out_shape=jax.ShapeDtypeStruct((N, C, HW), x.dtype),
        grid_spec=pltpu.PrefetchScalarGridSpec(
            num_scalar_prefetch=0,
            grid=grid,
            in_specs=[
                pl.BlockSpec((C, 1), lambda n, s: (0, 0)),              # weight (resident)
                pl.BlockSpec((1, C, tile_hw), lambda n, s: (n, 0, s)),  # x tile
            ],
            out_specs=pl.BlockSpec((1, C, tile_hw), lambda n, s: (n, 0, s)),
        ),
        compiler_params=pltpu.CompilerParams(
            # No cross-block state: shard both axes across TensorCores (v7x).
            dimension_semantics=("parallel", "parallel"),
            vmem_limit_bytes=vmem_limit,
        ),
    )(w2, x2)

    return out.reshape(N, C, H, W)


if __name__ == "__main__":
    key = jax.random.PRNGKey(0)
    N, C, H, W = 2, 4, 16, 16

    x = jax.random.normal(key, (N, C, H, W), dtype=jnp.float32)
    # Deterministic parameter init: PyTorch leaves weight uninitialized in
    # __init__ (normally filled with `scale` by init_weights); use scale=20.0.
    weight = jnp.full((C,), 20.0, dtype=jnp.float32)

    out = l2norm(x, weight, eps=1e-10)
    out = jax.block_until_ready(out)

    # Pure-JAX reference check (exact-divide path -> tight tolerance).
    xf = x.astype(jnp.float32)
    nrm = jnp.sqrt(jnp.sum(xf * xf, axis=1, keepdims=True)) + 1e-10
    ref = (weight[None, :, None, None] * xf / nrm).astype(x.dtype)
    assert jnp.allclose(out, ref, atol=1e-5, rtol=1e-5), "mismatch vs reference"

    print("KERNEL_OK")
</pallas_src>

<mosaic_0001>
module attributes {stable_mosaic.version = 11 : i64} {
  func.func @_l2norm_kernel(%arg0: i32, %arg1: i32, %arg2: memref<4x1xf32, #tpu.memory_space<vmem>>, %arg3: memref<1x4x256xf32, #tpu.memory_space<vmem>>, %arg4: memref<1x4x256xf32, #tpu.memory_space<vmem>>) attributes {dimension_semantics = [#tpu.dimension_semantics<parallel>, #tpu.dimension_semantics<parallel>], iteration_bounds = array<i64: 2, 1>, scalar_prefetch = 0 : i64, scratch_operands = 0 : i64, tpu.core_type = #tpu.core_type<tc>, window_params = [{pipeline_mode = #tpu.pipeline_mode<synchronous>, transform_indices = @transform_0, window_bounds = array<i64: 4, 1>}, {transform_indices = @transform_1, window_bounds = array<i64: 1, 4, 256>}, {transform_indices = @transform_2, window_bounds = array<i64: 1, 4, 256>}]} {
    %c0 = arith.constant 0 : index
    %c0_0 = arith.constant 0 : index
    %c0_1 = arith.constant 0 : index
    %0 = vector.load %arg3[%c0, %c0_0, %c0_1] : memref<1x4x256xf32, #tpu.memory_space<vmem>>, vector<1x4x256xf32>
    %1 = arith.mulf %0, %0 : vector<1x4x256xf32>
    %cst = arith.constant dense<0.000000e+00> : vector<1x256xf32>
    %2 = vector.multi_reduction <add>, %1, %cst [1] : vector<1x4x256xf32> to vector<1x256xf32>
    %3 = vector.shape_cast %2 : vector<1x256xf32> to vector<1x1x256xf32>
    %4 = math.sqrt %3 : vector<1x1x256xf32>
    %cst_2 = arith.constant 1.000000e-10 : f32
    %5 = vector.broadcast %cst_2 : f32 to vector<1x1x256xf32>
    %6 = arith.addf %4, %5 : vector<1x1x256xf32>
    %7 = tpu.reciprocal %6 : vector<1x1x256xf32> -> vector<1x1x256xf32>
    %c0_3 = arith.constant 0 : index
    %c0_4 = arith.constant 0 : index
    %8 = vector.load %arg2[%c0_3, %c0_4] : memref<4x1xf32, #tpu.memory_space<vmem>>, vector<4x1xf32>
    %9 = vector.shape_cast %8 : vector<4x1xf32> to vector<1x4x1xf32>
    %10 = vector.broadcast %7 : vector<1x1x256xf32> to vector<1x4x256xf32>
    %11 = arith.mulf %0, %10 : vector<1x4x256xf32>
    %12 = vector.broadcast %9 : vector<1x4x1xf32> to vector<1x4x256xf32>
    %13 = arith.mulf %11, %12 : vector<1x4x256xf32>
    %c0_5 = arith.constant 0 : index
    %c0_6 = arith.constant 0 : index
    %c0_7 = arith.constant 0 : index
    %14 = vector.load %arg4[%c0_5, %c0_6, %c0_7] : memref<1x4x256xf32, #tpu.memory_space<vmem>>, vector<1x4x256xf32>
    tpu.vector_store %arg4[%c0_5, %c0_6, %c0_7], %13 {strides = array<i32>} : memref<1x4x256xf32, #tpu.memory_space<vmem>>, vector<1x4x256xf32>,
    return
  }
  func.func @transform_0(%arg0: i32, %arg1: i32) -> (i32, i32) {
    %c0_i32 = arith.constant 0 : i32
    %c0_i32_0 = arith.constant 0 : i32
    %c0_i32_1 = arith.constant 0 : i32
    return %c0_i32, %c0_i32_0 : i32, i32
  }
  func.func @transform_1(%arg0: i32, %arg1: i32) -> (i32, i32, i32) {
    %c0_i32 = arith.constant 0 : i32
    %c0_i32_0 = arith.constant 0 : i32
    return %arg0, %c0_i32, %arg1 : i32, i32, i32
  }
  func.func @transform_2(%arg0: i32, %arg1: i32) -> (i32, i32, i32) {
    %c0_i32 = arith.constant 0 : i32
    %c0_i32_0 = arith.constant 0 : i32
    return %arg0, %c0_i32, %arg1 : i32, i32, i32
  }
}

</mosaic_0001>

<bundles_post_ra>
// kernel: tpu_custom_call.1
= control target key start
LH: loop header
LB: loop body
LE: loop exit
PB: predicated region body
PF: predicated region fallthrough
CT: control target
= control target key end

     0   :  { %7 = vsyncpa [#allocation3], 0  ;;  %s736_s0 = inlined_call_operand.vmem [shape: f32[4,1], index: 0, kind: input, shape index: {}]   ;;  %s737_s1 = inlined_call_operand.hbm [shape: f32[2,4,256], index: 1, kind: input, shape index: {}]   ;;  %s738_s2 = inlined_call_operand.hbm [shape: f32[2,4,256], index: 2, kind: output, shape index: {}]  }
   0x1   :  { %9 = vsyncpa [#allocation3 + $0x1], 0 }
   0x2   :  { %10 = vsyncpa [#allocation4], 0 }
   0x3   :  { %12 = vsyncpa [#allocation4 + $0x1], 0  ;;  %s601_s9 = smov 0   ;;  %s603_s10 = smov 0  }
   0x4   :  { %s605_s11 = smov 0   ;;  %s607_s12 = smov 0  }
   0x5   :  { %s609_s13 = smov 0   ;;  %s611_s14 = smov 0  }
   0x6 LB: > { %s380_s15 = sadd.s32 4294967295, %s582_s14   ;;  %s381_s16 = sadd.s32 4294967294, %s582_s14   ;;  %s582_s14 = sphi %s611_s14, %s18_s14   ;;  %s578_s13 = sphi %s609_s13, %s747_s13   ;;  %s574_s12 = sphi %s607_s12, %s746_s12   ;;  %s570_s11 = sphi %s605_s11, %s745_s11   ;;  %s566_s10 = sphi %s603_s10, %s744_s10   ;;  %s562_s9 = sphi %s601_s9, %s743_s9  }
   0x7   : > { %s30_s17 = sadd.s32 1, %s578_s13  ;;  %s60_s18 = sadd.s32 1, %s570_s11 }
   0x8   : > { %p32_p0 = scmp.ge.s32.totalorder %s30_s17, 2  ;;  %p67_p1 = scmp.ne.s32.totalorder %s570_s11, %s566_s10 }
   0x9   : > { %p68_p2 = scmp.eq.s32.totalorder %s582_s14, 0  ;;  %p73_p3 = scmp.ne.s32.totalorder %s566_s10, %s562_s9 }
   0xa   : > { %s749_s17 = smov (%p32_p0, %s30_s17), 0  ;;  %p74_p5 = scmp.eq.s32.totalorder %s380_s15, 0 }
   0xb   : > { %p642_p4 = por %p68_p2, %p67_p1  ;;  %s55_s20 = ssub.s32 %s578_s13, %s749_s17 }
   0xc   : > { %p99_p6 = scmp.eq.s32.totalorder %s380_s15, 1  ;;  %p58_p7 = scmp.eq.s32.totalorder %s55_s20, 0 }
   0xd   : > { %p648_p8 = por %p74_p5, %p73_p3  ;;  %p105_p10 = scmp.eq.s32.totalorder %s381_s16, 1 }
   0xe   : > { %p652_p9 = por %p99_p6, %p67_p1  ;;  %p383_p12 = scmp.ge.s32.totalorder %s582_s14, 2 }
   0xf   : > { %s657_s23 = scalar_select %p58_p7, %s570_s11, %s60_s18  }
  0x10   : > { %p659_p11 = por %p105_p10, %p73_p3  ;;  %p409_p13 = scmp.lt.s32.totalorder %s582_s14, 2 }
  0x11   : > { %s128_s25 = sand.u32 1, %s570_s11   ;;  %s395_s27 = sshll.u32 %s578_s13, 3 }
  0x12   : > { %s384_s26 = sshll.u32 %s128_s25, 3  ;;  %s139_s30 = scalar_lea.hbm %s737_s1, %s395_s27 }
  0x13   : > { %s132_s3 = scalar_lea.vmem [#allocation2], %s384_s26  ;;  %s141_s5 = sshll.u32 %s139_s30, 4  ;;  %s142_s5 = int_to_ptr.hbm [resolvable:$true] %s141_s5 }
  0x14   : > { %s143_s4 = sshll.u32 %s132_s3, 4  ;;  %p402_p0 = pnand %p409_p13, %p642_p4  ;;  %s144_s4 = int_to_ptr.vmem [resolvable:$true] %s143_s4 }
  0x15   : > { %p387_p1 = scmp.ge.s32.totalorder %s582_s14, 1  ;;  %p148_p2 = scmp.lt.s32.totalorder %s582_s14, 3 }
  0x16   : > { %s129_s6 = scalar_lea.sflag [#allocation3], %s128_s25 }
  0x17   : > { %404 = dma.hbm_to_vmem [thread:$0]  (!%p402_p0), %s142_s5, 128, %s144_s4, %s129_s6  }
  0x18   : > { %p149_p3 = pnand %p387_p1, %p148_p2 }
  0x19   : > { %s675_s7 = sand.u32 (!%p149_p3), 1, %s566_s10  }
  0x1a   : > { %152 = sbr.rel (%p149_p3) target bundleno = 156 (0x9c), region = 28  ;;  %s388_s8 = sshll.u32 (!%p149_p3), %s675_s7, 3 }
  0x1b   : > { %s155_s15 = scalar_lea.sflag (!%p149_p3), [#allocation3], %s675_s7  ;;  %s158_s16 = scalar_lea.vmem (!%p149_p3), [#allocation2], %s388_s8 }
  0x1f   : > { %553 = dma.done.wait (%p648_p8), %s155_s15, 128  }
  0x20   : > { %555 = vsyncadd (%p648_p8), %s155_s15, 4294967168  ;;  %v584_v0 = vmov 0   ;;  %v259_v1 = vld [vmem:[%s736_s0] sm:$0xf]  ;;  %v688_v2 = vld [vmem:[%s158_s16] sm:$0xff]  ;;  %vm190_vm0 = vcmask 1043456  }
  0x21   : > { %461 = vset.pattern.permute.xlu0 %v584_v0  ;;  %v183_v3 = vmul.f32 %v688_v2, %v688_v2  ;;  %v585_v62 = vmov 839922192   ;;  %s396_s20 = sshll.u32 %s574_s12, 3  ;;  %s179_s27 = scalar_lea.vmem [#allocation5], %s388_s8 }
  0x22   : > { %268 = vperm.xlu0 %461, %v259_v1   ;;  %v271_v63 = vunpack.c.l.s4 %v585_v62  ;;  %s291_s26 = scalar_lea.hbm %s738_s2, %s396_s20  ;;  %s293_s28 = sshll.u32 %s179_s27, 4  ;;  %s294_s28 = int_to_ptr.vmem [resolvable:$true] %s293_s28 }
  0x23   : > { %185 = vst [vmem:[#allocation1] ss:$2 sm:$0xff] %v183_v3  ;;  %s295_s29 = sshll.u32 %s291_s26, 4  ;;  %s278_s12 = scalar_lea.sflag [#allocation4], %s675_s7  ;;  %s296_s29 = int_to_ptr.hbm [resolvable:$true] %s295_s29 }
  0x24   : > { %v272_v3 = vunpack.c.0.s8 %v271_v63  ;;  %s514_s30 = sshra.s32 %s296_s29, 4  ;;  %s520_s6 = scalar_lea.hbm %s738_s2, 16  ;;  %s515_s30 = int_to_ptr.hbm [resolvable:$true] %s514_s30 }
  0x25   : > { %s516_s3 = scalar_lea.hbm %s515_s30, 8  ;;  %p521_p7 = scmp.lt.s32.totalorder %s515_s30, %s738_s2 }
  0x26   : > { %p517_p4 = scmp.ne.s32.totalorder %s515_s30, %s516_s3  ;;  %p522_p8 = scmp.lt.s32.totalorder %s520_s6, %s516_s3 }
  0x28   : > { %p518_p5 = pnand %p517_p4, %p652_p9  ;;  %p523_p10 = por %p522_p8, %p521_p7 }
  0x2a   : > { %v187_v4 = vld.sshfl [vmem:[#allocation1 + $0x8] sm:$0xff pattern:$0x75316420]  ;;  %v186_v6 = vld.sshfl [vmem:[#allocation1] sm:$0xff pattern:$0x75316420]  ;;  %p519_p6 = pneg %p518_p5 }
  0x2b   : > { %v198_v5 = vsel %vm190_vm0, %v187_v4, 0.0  ;;  %v191_v8 = vsel %vm190_vm0, %v186_v6, 0.0 }
  0x2c   : > { %v199_v7 = vrot.slane %v198_v5, 4  ;;  %v192_v9 = vrot.slane %v191_v8, 4  ;;  %p524_p13 = pnand %p523_p10, %p519_p6 }
  0x2e   : > { %v200_v10 = vadd.f32 %v199_v7, %v198_v5  ;;  %v193_v11 = vadd.f32 %v192_v9, %v191_v8 }
  0x30   : > { %v201_v12 = vrot.slane %v200_v10, 2  ;;  %v194_v13 = vrot.slane %v193_v11, 2 }
  0x32   : > { %v202_v14 = vadd.f32 %v201_v12, %v200_v10  ;;  %v195_v15 = vadd.f32 %v194_v13, %v193_v11 }
  0x34   : > { %v203_v16 = vrot.slane %v202_v14, 1  ;;  %v196_v17 = vrot.slane %v195_v15, 1 }
  0x36   : > { %v204_v18 = vadd.f32 %v203_v16, %v202_v14  ;;  %v197_v19 = vadd.f32 %v196_v17, %v195_v15 }
  0x38   : > { %462 = vrsqrt.f32 %v204_v18  ;;  %vm224_vm1 = vcmp.eq.f32.partialorder %v204_v18, inf  ;;  %v227_v33 = vand.u32 2147483648, %v204_v18  ;;  %vm226_vm2 = vcmp.eq.f32.partialorder %v204_v18, 0.0 }
  0x39   : > { %464 = vrsqrt.f32 %v197_v19  ;;  %vm212_vm3 = vcmp.eq.f32.partialorder %v197_v19, inf  ;;  %v215_v36 = vand.u32 2147483648, %v197_v19  ;;  %vm214_vm4 = vcmp.eq.f32.partialorder %v197_v19, 0.0 }
  0x3e   : > { %v463_v20 = vpop.eup %462 }
  0x3f   : > { %v218_v21 = vmul.f32 %v463_v20, %v204_v18  ;;  %v465_v22 = vpop.eup %464 }
  0x40   : > { %v206_v23 = vmul.f32 %v465_v22, %v197_v19 }
  0x41   : > { %v219_v24 = vmul.f32 %v463_v20, %v218_v21 }
  0x42   : > { %v207_v25 = vmul.f32 %v465_v22, %v206_v23 }
  0x43   : > { %v220_v26 = vmul.f32 0.5, %v219_v24 }
  0x44   : > { %v208_v27 = vmul.f32 0.5, %v207_v25 }
  0x45   : > { %v221_v28 = vsub.f32 1.5, %v220_v26 }
  0x46   : > { %v209_v29 = vsub.f32 1.5, %v208_v27 }
  0x47   : > { %v222_v30 = vmul.f32 %v463_v20, %v221_v28 }
  0x48   : > { %v210_v31 = vmul.f32 %v465_v22, %v209_v29 }
  0x49   : > { %v223_v32 = vmul.f32 %v222_v30, %v204_v18 }
  0x4a   : > { %v211_v34 = vmul.f32 %v210_v31, %v197_v19 }
  0x4b   : > { %v225_v35 = vsel %vm224_vm1, %v204_v18, %v223_v32 }
  0x4c   : > { %v228_v37 = vsel %vm226_vm2, %v227_v33, %v225_v35  ;;  %v213_v38 = vsel %vm212_vm3, %v197_v19, %v211_v34 }
  0x4d   : > { %v230_v39 = vadd.f32 1e-10, %v228_v37  ;;  %v216_v40 = vsel %vm214_vm4, %v215_v36, %v213_v38 }
  0x4e   : > { %v229_v41 = vadd.f32 1e-10, %v216_v40 }
  0x4f   : > { %466 = vrcp.f32 %v230_v39  ;;  %vm250_vm5 = vweird.f32 %v230_v39  ;;  %v256_v49 = vand.u32 2147483648, %v230_v39  ;;  %v254_v52 = vand.u32 2147483647, %v230_v39 }
  0x50   : > { %468 = vrcp.f32 %v229_v41  ;;  %vm236_vm8 = vweird.f32 %v229_v41  ;;  %v242_v53 = vand.u32 2147483648, %v229_v41  ;;  %v240_v56 = vand.u32 2147483647, %v229_v41 }
  0x51   : > { %v257_v54 = vor.u32 1.1754944e-38, %v256_v49  ;;  %vm255_vm10 = vcmp.eq.f32.partialorder %v254_v52, 8.507059e+37 }
  0x52   : > { %v243_v58 = vor.u32 1.1754944e-38, %v242_v53  ;;  %vm241_vm12 = vcmp.eq.f32.partialorder %v240_v56, 8.507059e+37 }
  0x55   : > { %v467_v42 = vpop.eup %466 }
  0x56   : > { %v246_v43 = vmul.f32 %v467_v42, %v230_v39  ;;  %v469_v44 = vpop.eup %468  ;;  %vm251_vm6 = vweird.f32 %v467_v42 }
  0x57   : > { %v232_v45 = vmul.f32 %v469_v44, %v229_v41  ;;  %vm252_vm7 = vmor %vm250_vm5, %vm251_vm6  ;;  %vm237_vm9 = vweird.f32 %v469_v44 }
  0x58   : > { %v247_v46 = vsub.f32 1.0, %v246_v43  ;;  %vm238_vm11 = vmor %vm236_vm8, %vm237_vm9 }
  0x59   : > { %v233_v47 = vsub.f32 1.0, %v232_v45 }
  0x5a   : > { %v248_v48 = vmul.f32 %v467_v42, %v247_v46 }
  0x5b   : > { %v234_v50 = vmul.f32 %v469_v44, %v233_v47 }
  0x5c   : > { %v249_v51 = vadd.f32 %v467_v42, %v248_v48 }
  0x5d   : > { %v235_v55 = vadd.f32 %v469_v44, %v234_v50 }
  0x5e   : > { %v253_v57 = vsel %vm252_vm7, %v467_v42, %v249_v51 }
  0x5f   : > { %v258_v59 = vsel %vm255_vm10, %v257_v54, %v253_v57  ;;  %v239_v60 = vsel %vm238_vm11, %v469_v44, %v235_v55 }
  0x60   : > { %v262_v61 = vrot.slane %v258_v59, 4  ;;  %v244_v0 = vsel %vm241_vm12, %v243_v58, %v239_v60 }
  0x62   : > { %v263_v1 = vsel %vm190_vm0, %v244_v0, %v262_v61 }
  0x63   : > { %v265_v4 = vmul.f32 %v263_v1, %v688_v2 }
  0x94   : > { %v269_v5 = vpop.permute.xlu0 %268 }
  0x95   : > { %v273_v6 = vperm.slane %v269_v5, %v272_v3 }
  0x97   : > { %v275_v7 = vmul.f32 %v273_v6, %v265_v4 }
  0x99   : > { %276 = vst [vmem:[%s179_s27] sm:$0xff] %v275_v7 }
  0x9a   : > { %527 = shalt.err (!%p524_p13)
}
  0x9b   : > { %399 = dma.vmem_to_hbm [thread:$0]  (%p652_p9), %s294_s28, 128, %s296_s29, %s278_s12  }
  0x9c PF: > { %s307_s7 = sand.u32 1, %s562_s9   ;;  %p406_p0 = pnand %p383_p12, %p659_p11 }
  0x9d   : > { %s308_s16 = scalar_lea.sflag [#allocation4], %s307_s7 }
  0x9e   : > { %p407_p1 = pneg %p406_p0 }
  0xa0   : > { %557 = dma.done.wait (%p407_p1), %s308_s16, 128  }
  0xa1   : > { %559 = vsyncadd (%p407_p1), %s308_s16, 4294967168  ;;  %s18_s14 = sadd.s32 1, %s582_s14   ;;  %s743_s9 = smov %s566_s10 }
  0xa2   : > { %p15_p2 = scmp.ge.s32.totalorder %s18_s14, 4   ;;  %s744_s10 = smov %s570_s11 }
  0xa3   : > { %s745_s11 = smov %s657_s23  ;;  %s746_s12 = smov %s578_s13 }
  0xa4   : > { %s747_s13 = smov %s749_s17  ;;  %17 = sbr.rel (!%p15_p2) target bundleno = 6 (0x6), region = 73 }
  0xa9   :  { %314 = vsyncpa [#allocation3], 1 }
  0xaa   :  { %316 = vsyncpa [#allocation3 + $0x1], 1 }
  0xab   :  { %317 = vsyncpa [#allocation4], 1 }
  0xac   :  { %319 = vsyncpa [#allocation4 + $0x1], 1 }

</bundles_post_ra>
